<compile_context>
chip_gen: v5e
topology: v5e:2x2
jax: 0.10.0
libtpu: 0.0.40
codegen_flags: <defaults>
</compile_context>

<pallas_src>
import functools

import jax
import jax.numpy as jnp
from jax.experimental import pallas as pl
from jax.experimental.pallas import tpu as pltpu


def fastformer_head_kernel(x_ref, wqkv_ref, wr_ref, o_ref, *,
                           seq, emb, head, b_blk):
    # x block: (b_blk, t, e).  Flatten to (b_blk*t, e); with t == 8 this is a
    # pure sublane split, i.e. layout-free.
    x2 = x_ref[...].reshape(b_blk * seq, emb)

    # Fused projection: one MXU push with N = 3*head lanes instead of three
    # narrow (N = head) pushes.
    qkv = jnp.dot(x2, wqkv_ref[...],
                  preferred_element_type=jnp.float32)        # (b_blk*t, 3h)
    q = qkv[:, :head]
    k = qkv[:, head:2 * head]
    v = qkv[:, 2 * head:]

    q3 = q.reshape(b_blk, seq, head)
    k3 = k.reshape(b_blk, seq, head)
    v3 = v.reshape(b_blk, seq, head)

    # Reference applies softmax over dim=-1 of a (.., 1) tensor -> the
    # attention weights are exactly 1.0, so global pooling is a plain sum
    # over the sequence axis (the 1/sqrt(e) logit scale is irrelevant).
    global_q = jnp.sum(q3, axis=1, keepdims=True)            # (b_blk, 1, h)
    p = global_q * k3                                        # (b_blk, t, h)
    global_k = jnp.sum(p, axis=1, keepdims=True)             # (b_blk, 1, h)
    u = global_k * v3                                        # (b_blk, t, h)

    r = jnp.dot(u.reshape(b_blk * seq, head), wr_ref[...],
                preferred_element_type=jnp.float32)          # (b_blk*t, h)

    o_ref[...] = (r + q).reshape(b_blk, seq, head).astype(o_ref.dtype)


def prepare_fastformer_params(wq, wk, wv, wr):
    """One-time host-side parameter prep.

    PyTorch nn.Linear weights are (out, in); transpose to (in, out) and fuse
    the three projections so the kernel does a single `x @ W_qkv`.
    The two attention-logit weights are mathematically inert (softmax over a
    size-1 axis) and are therefore not needed by the kernel at all.
    """
    w_qkv = jnp.concatenate([wq.T, wk.T, wv.T], axis=1)   # (e, 3h)
    wr_t = wr.T                                           # (h, h)
    return w_qkv, wr_t


def _pick_batch_block(b, cap):
    """Largest divisor of b that is <= cap; prefer keeping >= 2 grid steps
    so both v7x TensorCores get work."""
    divs = [d for d in range(1, min(b, cap) + 1) if b % d == 0]
    multi = [d for d in divs if b // d >= 2]
    return max(multi) if multi else max(divs)


def fastformer_head(x, w_qkv, wr_t, *, batch_block=8):
    """x: (b, t, e); w_qkv: (e, 3h) fused [Wq^T | Wk^T | Wv^T]; wr_t: (h, h)."""
    b, t, e = x.shape
    h = wr_t.shape[0]
    assert w_qkv.shape == (e, 3 * h)

    b_blk = _pick_batch_block(b, batch_block)
    grid_b = b // b_blk

    kernel = functools.partial(
        fastformer_head_kernel, seq=t, emb=e, head=h, b_blk=b_blk)

    return pl.pallas_call(
        kernel,
        out_shape=jax.ShapeDtypeStruct((b, t, h), x.dtype),
        grid_spec=pltpu.PrefetchScalarGridSpec(
            num_scalar_prefetch=0,
            grid=(grid_b,),
            in_specs=[
                pl.BlockSpec((b_blk, t, e), lambda i: (i, 0, 0)),   # x tile
                pl.BlockSpec((e, 3 * h), lambda i: (0, 0)),         # fused W_qkv
                pl.BlockSpec((h, h), lambda i: (0, 0)),             # Wr^T
            ],
            out_specs=pl.BlockSpec((b_blk, t, h), lambda i: (i, 0, 0)),
        ),
        compiler_params=pltpu.CompilerParams(
            dimension_semantics=("parallel",)),
    )(x, w_qkv, wr_t)


def fastformer_head_ref(x, wq, wk, wv, wr, wqa, wka):
    """Pure-JAX reference mirroring the PyTorch forward (incl. the size-1 softmax)."""
    b, t, e = x.shape
    q = x @ wq.T
    k = x @ wk.T
    v = x @ wv.T
    q_logits = (q @ wqa.T) / (e ** 0.5)                   # (b, t, 1)
    alpha = jax.nn.softmax(q_logits, axis=-1)
    global_q = jnp.sum(alpha * q, axis=1)                 # (b, h)
    p = global_q[:, None, :] * k
    k_logits = (p @ wka.T) / (e ** 0.5)
    beta = jax.nn.softmax(k_logits, axis=-1)
    global_k = jnp.sum(beta * p, axis=1)                  # (b, h)
    u = global_k[:, None, :] * v
    r = u @ wr.T
    return r + q


if __name__ == "__main__":
    b, t, emb, head = 4, 8, 32, 32
    key = jax.random.PRNGKey(0)
    kx, kq, kk, kv, kr, kqa, kka = jax.random.split(key, 7)

    x = jax.random.normal(kx, (b, t, emb), dtype=jnp.float32)

    # Deterministic nn.Linear-style init: uniform(-1/sqrt(in), 1/sqrt(in)).
    def init(k, out_f, in_f):
        bound = 1.0 / (in_f ** 0.5)
        return jax.random.uniform(k, (out_f, in_f), jnp.float32, -bound, bound)

    wq = init(kq, head, emb)
    wk = init(kk, head, emb)
    wv = init(kv, head, emb)
    wr = init(kr, head, head)
    wqa = init(kqa, 1, head)   # inert: softmax over size-1 axis == 1.0
    wka = init(kka, 1, head)   # inert: softmax over size-1 axis == 1.0

    # One-time parameter prep (outside any per-call trace).
    w_qkv, wr_t = prepare_fastformer_params(wq, wk, wv, wr)

    out = fastformer_head(x, w_qkv, wr_t, batch_block=8)
    out = jax.block_until_ready(out)

    ref = fastformer_head_ref(x, wq, wk, wv, wr, wqa, wka)
    assert out.shape == (b, t, head)
    assert jnp.allclose(out, ref, rtol=1e-5, atol=1e-5)

    print("KERNEL_OK")
</pallas_src>

<mosaic_0001>
module attributes {stable_mosaic.version = 11 : i64} {
  func.func @fastformer_head_kernel(%arg0: i32, %arg1: memref<2x8x32xf32, #tpu.memory_space<vmem>>, %arg2: memref<32x96xf32, #tpu.memory_space<vmem>>, %arg3: memref<32x32xf32, #tpu.memory_space<vmem>>, %arg4: memref<2x8x32xf32, #tpu.memory_space<vmem>>) attributes {dimension_semantics = [#tpu.dimension_semantics<parallel>], iteration_bounds = array<i64: 2>, scalar_prefetch = 0 : i64, scratch_operands = 0 : i64, tpu.core_type = #tpu.core_type<tc>, window_params = [{transform_indices = @transform_0, window_bounds = array<i64: 2, 8, 32>}, {pipeline_mode = #tpu.pipeline_mode<synchronous>, transform_indices = @transform_1, window_bounds = array<i64: 32, 96>}, {pipeline_mode = #tpu.pipeline_mode<synchronous>, transform_indices = @transform_2, window_bounds = array<i64: 32, 32>}, {transform_indices = @transform_3, window_bounds = array<i64: 2, 8, 32>}]} {
    %c0 = arith.constant 0 : index
    %c0_0 = arith.constant 0 : index
    %c0_1 = arith.constant 0 : index
    %0 = vector.load %arg1[%c0, %c0_0, %c0_1] : memref<2x8x32xf32, #tpu.memory_space<vmem>>, vector<2x8x32xf32>
    %1 = vector.shape_cast %0 : vector<2x8x32xf32> to vector<16x32xf32>
    %c0_2 = arith.constant 0 : index
    %c0_3 = arith.constant 0 : index
    %2 = vector.load %arg2[%c0_2, %c0_3] : memref<32x96xf32, #tpu.memory_space<vmem>>, vector<32x96xf32>
    %cst = arith.constant dense<0.000000e+00> : vector<16x96xf32>
    %3 = tpu.matmul %1, %2, %cst {dimension_numbers = #tpu.dot_dimension_numbers<[1], [0], [0], [1], [0, 0, 1, 1], [], []>} : vector<16x32xf32>, vector<32x96xf32>, vector<16x96xf32> -> vector<16x96xf32>
    %4 = vector.extract_strided_slice %3 {offsets = [0, 0], sizes = [16, 32], strides = [1, 1]} : vector<16x96xf32> to vector<16x32xf32>
    %5 = vector.extract_strided_slice %3 {offsets = [0, 32], sizes = [16, 32], strides = [1, 1]} : vector<16x96xf32> to vector<16x32xf32>
    %6 = vector.extract_strided_slice %3 {offsets = [0, 64], sizes = [16, 32], strides = [1, 1]} : vector<16x96xf32> to vector<16x32xf32>
    %7 = vector.shape_cast %4 : vector<16x32xf32> to vector<2x8x32xf32>
    %8 = vector.shape_cast %5 : vector<16x32xf32> to vector<2x8x32xf32>
    %9 = vector.shape_cast %6 : vector<16x32xf32> to vector<2x8x32xf32>
    %cst_4 = arith.constant dense<0.000000e+00> : vector<2x32xf32>
    %10 = vector.multi_reduction <add>, %7, %cst_4 [1] : vector<2x8x32xf32> to vector<2x32xf32>
    %11 = vector.shape_cast %10 : vector<2x32xf32> to vector<2x1x32xf32>
    %12 = vector.broadcast %11 : vector<2x1x32xf32> to vector<2x8x32xf32>
    %13 = arith.mulf %12, %8 : vector<2x8x32xf32>
    %cst_5 = arith.constant dense<0.000000e+00> : vector<2x32xf32>
    %14 = vector.multi_reduction <add>, %13, %cst_5 [1] : vector<2x8x32xf32> to vector<2x32xf32>
    %15 = vector.shape_cast %14 : vector<2x32xf32> to vector<2x1x32xf32>
    %16 = vector.broadcast %15 : vector<2x1x32xf32> to vector<2x8x32xf32>
    %17 = arith.mulf %16, %9 : vector<2x8x32xf32>
    %18 = vector.shape_cast %17 : vector<2x8x32xf32> to vector<16x32xf32>
    %c0_6 = arith.constant 0 : index
    %c0_7 = arith.constant 0 : index
    %19 = vector.load %arg3[%c0_6, %c0_7] : memref<32x32xf32, #tpu.memory_space<vmem>>, vector<32x32xf32>
    %cst_8 = arith.constant dense<0.000000e+00> : vector<16x32xf32>
    %20 = tpu.matmul %18, %19, %cst_8 {dimension_numbers = #tpu.dot_dimension_numbers<[1], [0], [0], [1], [0, 0, 1, 1], [], []>} : vector<16x32xf32>, vector<32x32xf32>, vector<16x32xf32> -> vector<16x32xf32>
    %21 = arith.addf %20, %4 : vector<16x32xf32>
    %22 = vector.shape_cast %21 : vector<16x32xf32> to vector<2x8x32xf32>
    %c0_9 = arith.constant 0 : index
    %c0_10 = arith.constant 0 : index
    %c0_11 = arith.constant 0 : index
    %23 = vector.load %arg4[%c0_9, %c0_10, %c0_11] : memref<2x8x32xf32, #tpu.memory_space<vmem>>, vector<2x8x32xf32>
    tpu.vector_store %arg4[%c0_9, %c0_10, %c0_11], %22 {strides = array<i32>} : memref<2x8x32xf32, #tpu.memory_space<vmem>>, vector<2x8x32xf32>,
    return
  }
  func.func @transform_0(%arg0: i32) -> (i32, i32, i32) {
    %c0_i32 = arith.constant 0 : i32
    %c0_i32_0 = arith.constant 0 : i32
    %c0_i32_1 = arith.constant 0 : i32
    return %arg0, %c0_i32, %c0_i32_0 : i32, i32, i32
  }
  func.func @transform_1(%arg0: i32) -> (i32, i32) {
    %c0_i32 = arith.constant 0 : i32
    %c0_i32_0 = arith.constant 0 : i32
    %c0_i32_1 = arith.constant 0 : i32
    return %c0_i32, %c0_i32_0 : i32, i32
  }
  func.func @transform_2(%arg0: i32) -> (i32, i32) {
    %c0_i32 = arith.constant 0 : i32
    %c0_i32_0 = arith.constant 0 : i32
    %c0_i32_1 = arith.constant 0 : i32
    return %c0_i32, %c0_i32_0 : i32, i32
  }
  func.func @transform_3(%arg0: i32) -> (i32, i32, i32) {
    %c0_i32 = arith.constant 0 : i32
    %c0_i32_0 = arith.constant 0 : i32
    %c0_i32_1 = arith.constant 0 : i32
    return %arg0, %c0_i32, %c0_i32_0 : i32, i32, i32
  }
}

</mosaic_0001>

<bundles_post_ra>
// kernel: tpu_custom_call.1
= control target key start
LH: loop header
LB: loop body
LE: loop exit
PB: predicated region body
PF: predicated region fallthrough
CT: control target
= control target key end

     0   :  { %8 = vsyncpa [#allocation3], 0  ;;  %s922_s0 = inlined_call_operand.hbm [shape: f32[4,8,32], index: 0, kind: input, shape index: {}]   ;;  %s923_s1 = inlined_call_operand.hbm [shape: f32[32,96], index: 1, kind: input, shape index: {}]   ;;  %s924_s2 = inlined_call_operand.hbm [shape: f32[32,32], index: 2, kind: input, shape index: {}]   ;;  %s925_s3 = inlined_call_operand.hbm [shape: f32[4,8,32], index: 3, kind: output, shape index: {}]  }
   0x1   :  { %10 = vsyncpa [#allocation3 + $0x1], 0 }
   0x2   :  { %11 = vsyncpa [#allocation6], 0 }
   0x3   :  { %12 = vsyncpa [#allocation4], 0 }
   0x4   :  { %14 = vsyncpa [#allocation4 + $0x1], 0  ;;  %s746_s12 = smov 0   ;;  %s748_s13 = smov 0  }
   0x5   :  { %s750_s14 = smov 0   ;;  %s752_s15 = smov 0  }
   0x6 LB: > { %s767_s16 = sadd.s32 4294967295, %s716_s15   ;;  %s451_s17 = sadd.s32 4294967294, %s716_s15   ;;  %s716_s15 = sphi %s752_s15, %s935_s15   ;;  %s712_s14 = sphi %s750_s14, %s934_s14   ;;  %s708_s13 = sphi %s748_s13, %s933_s13   ;;  %s704_s12 = sphi %s746_s12, %s932_s12  }
   0x7   : > { %p40_p0 = scmp.ne.s32.totalorder %s708_s13, %s704_s12  ;;  %p41_p1 = scmp.eq.s32.totalorder %s767_s16, 0 }
   0x8   : > { %p106_p2 = scmp.eq.s32.totalorder %s767_s16, 1  ;;  %p112_p3 = scmp.eq.s32.totalorder %s451_s17, 1 }
   0x9   : > { %p776_p4 = por %p41_p1, %p40_p0  ;;  %p452_p5 = scmp.ge.s32.totalorder %s716_s15, 1 }
   0xa   : > { %p781_p6 = por %p112_p3, %p40_p0  ;;  %p119_p7 = scmp.lt.s32.totalorder %s716_s15, 3 }
   0xb   : > { %s130_s22 = sshll.u32 %s923_s1, 4  ;;  %s718_s24 = smov [#allocation5]   ;;  %s131_s22 = int_to_ptr.hbm [resolvable:$true] %s130_s22 }
   0xc   : > { %p789_p8 = pnand %p452_p5, %p119_p7  ;;  %s132_s25 = sshll.u32 %s718_s24, 4  ;;  %s133_s25 = int_to_ptr.vmem [resolvable:$true] %s132_s25 }
   0xd   : > { %s144_s28 = sshll.u32 %s924_s2, 4  ;;  %s719_s29 = smov 128   ;;  %s145_s28 = int_to_ptr.hbm [resolvable:$true] %s144_s28 }
   0xe   : > { %p495_p9 = pneg %p789_p8  ;;  %s720_s30 = smov 8  }
   0xf   : > { %s721_s4 = smov [#allocation7]   ;;  %s808_s6 = sadd.s32 1, %s716_s15  }
  0x10   : > { %p496_p10 = pnand %p495_p9, %p41_p1  ;;  %s146_s5 = sshll.u32 %s721_s4, 4  ;;  %s147_s5 = int_to_ptr.vmem [resolvable:$true] %s146_s5 }
  0x11   : > { %s27_s7 = sadd.s32 1, %s712_s14  ;;  %s24_s8 = ssub.s32 %s716_s15, %s808_s6 }
  0x12   : > { %498 = dma.hbm_to_vmem [thread:$0]  (!%p496_p10), %s131_s22, 512, %s133_s25, [#allocation6], %s719_s29, %s719_s29, %s720_s30  }
  0x13   : > { %501 = dma.hbm_to_vmem [thread:$0]  (!%p496_p10), %s145_s28, 512, %s147_s5, [#allocation6], %s719_s29, %s719_s29, %s720_s30  }
  0x14   : > { %p34_p12 = scmp.ne.s32.totalorder %s712_s14, %s708_s13  ;;  %p25_p13 = scmp.eq.s32.totalorder %s24_s8, 0 }
  0x15   : > { %p35_p0 = scmp.eq.s32.totalorder %s716_s15, 0  ;;  %p512_p5 = scmp.lt.s32.totalorder %s716_s15, 2 }
  0x16   : > { %p818_p3 = por %p106_p2, %p34_p12  ;;  %s160_s11 = sand.u32 1, %s712_s14  }
  0x17   : > { %s824_s10 = scalar_select %p25_p13, %s712_s14, %s27_s7  }
  0x18   : > { %p36_p7 = por %p35_p0, %p34_p12  ;;  %s456_s17 = sshll.u32 %s160_s11, 4 }
  0x19   : > { %s473_s20 = sshll.u32 %s716_s15, 4  ;;  %s164_s25 = scalar_lea.vmem [#allocation2], %s456_s17 }
  0x1a   : > { %s169_s24 = scalar_lea.hbm %s922_s0, %s473_s20  ;;  %s172_s26 = sshll.u32 %s164_s25, 4  ;;  %s173_s26 = int_to_ptr.vmem [resolvable:$true] %s172_s26 }
  0x1b   : > { %s170_s27 = sshll.u32 %s169_s24, 4  ;;  %p831_p2 = pnand %p512_p5, %p36_p7  ;;  %s171_s27 = int_to_ptr.hbm [resolvable:$true] %s170_s27 }
  0x1c   : > { %s161_s4 = scalar_lea.sflag [#allocation3], %s160_s11  ;;  %s616_s5 = sshra.s32 %s171_s27, 4  ;;  %s617_s5 = int_to_ptr.hbm [resolvable:$true] %s616_s5 }
  0x1d   : > { %s618_s7 = scalar_lea.hbm %s617_s5, 16  ;;  %p620_p10 = pneg %p831_p2 }
  0x1e   : > { %p619_p9 = scmp.ne.s32.totalorder %s617_s5, %s618_s7  ;;  %s623_s20 = scalar_lea.hbm %s922_s0, 32 }
  0x1f   : > { %p624_p0 = scmp.lt.s32.totalorder %s617_s5, %s922_s0  ;;  %p625_p5 = scmp.lt.s32.totalorder %s623_s20, %s618_s7 }
  0x20   : > { %p621_p12 = pnand %p620_p10, %p619_p9 }
  0x21   : > { %p626_p7 = por %p625_p5, %p624_p0 }
  0x22   : > { %p622_p13 = pneg %p621_p12 }
  0x24   : > { %p627_p11 = pnand %p626_p7, %p622_p13 }
  0x26   : > { %630 = shalt.err (!%p627_p11)
}
  0x27   : > { %505 = dma.hbm_to_vmem [thread:$0]  (!%p831_p2), %s171_s27, 256, %s173_s26, %s161_s4, %s719_s29, %s719_s29, %s720_s30  }
  0x28   : > { %184 = sbr.rel (%p789_p8) target bundleno = 460 (0x1cc), region = 32  ;;  %s851_s11 = sand.u32 (!%p789_p8), 1, %s708_s13  }
  0x29   : > { %s460_s24 = sshll.u32 (!%p789_p8), %s851_s11, 4  ;;  %s187_s25 = scalar_lea.sflag (!%p789_p8), [#allocation3], %s851_s11 }
  0x2a   : > { %s190_s5 = scalar_lea.vmem (!%p789_p8), [#allocation2], %s460_s24 }
  0x2d   : > { %691 = dma.done.wait (%p776_p4), %s187_s25, 256  }
  0x2e   : > { %693 = vsyncadd (%p776_p4), %s187_s25, 4294967040 }
  0x2f   : > { %695 = dma.done.wait (%p41_p1), [#allocation6], 1024  }
  0x30   : > { %697 = vsyncadd (%p41_p1), [#allocation6], 4294966272  ;;  %v231_v0 = vld [vmem:[#allocation5 + $0x18] sm:$0xff]  ;;  %v230_v1 = vld [vmem:[#allocation5 + $0x10] sm:$0xff]  ;;  %vm232_vm0 = vcmask 261120   ;;  %s722_s18 = smov 64  }
  0x31   : > { %475 = vmatpush.msra.mxu2 %v231_v0  ;;  %251 = vmatpush.msra.mxu0 %v231_v0  ;;  %v229_v2 = vld [vmem:[#allocation5 + $0x8] sm:$0xff]  ;;  %v228_v3 = vld [vmem:[#allocation5] sm:$0xff]  ;;  %s723_s23 = smov 96   ;;  %v311_v9 = vld [vmem:[#allocation7 + $0x18] sm:$0xff]  ;;  %s474_s29 = sshll.u32 %s767_s16, 4 }
  0x32   : > { %v227_v4 = vld [vmem:[%s190_s5 + $0x8] sm:$0xff]  ;;  %v226_v5 = vld [vmem:[%s190_s5] sm:$0xff]  ;;  %479 = vmatpush.msra.mxu3 %v311_v9  ;;  %330 = vmatpush.msra.mxu1 %v311_v9  ;;  %s355_s27 = scalar_lea.hbm %s925_s3, %s474_s29  ;;  %s223_s28 = scalar_lea.vmem [#allocation8], %s460_s24 }
  0x33   : > { %476 = vmatpush.msra.mxu2 %v230_v1  ;;  %252 = vmatpush.msra.mxu0 %v230_v1  ;;  %v310_v11 = vld [vmem:[#allocation7 + $0x10] sm:$0xff]  ;;  %v309_v12 = vld [vmem:[#allocation7 + $0x8] sm:$0xff]  ;;  %v308_v15 = vld [vmem:[#allocation7] sm:$0xff]  ;;  %s356_s4 = sshll.u32 %s223_s28, 4  ;;  %s358_s7 = sshll.u32 %s355_s27, 4  ;;  %s357_s4 = int_to_ptr.vmem [resolvable:$true] %s356_s4  ;;  %s359_s7 = int_to_ptr.hbm [resolvable:$true] %s358_s7 }
  0x34   : > { %480 = vmatpush.msra.mxu3 %v310_v11  ;;  %331 = vmatpush.msra.mxu1 %v310_v11  ;;  %s344_s16 = scalar_lea.sflag [#allocation4], %s851_s11  ;;  %s660_s8 = sshra.s32 %s359_s7, 4  ;;  %s661_s8 = int_to_ptr.hbm [resolvable:$true] %s660_s8 }
  0x35   : > { %477 = vmatpush.msra.mxu2 %v229_v2  ;;  %253 = vmatpush.msra.mxu0 %v229_v2  ;;  %s662_s17 = scalar_lea.hbm %s661_s8, 16  ;;  %s666_s22 = scalar_lea.hbm %s925_s3, 32 }
  0x36   : > { %481 = vmatpush.msra.mxu3 %v309_v12  ;;  %332 = vmatpush.msra.mxu1 %v309_v12  ;;  %p663_p1 = scmp.ne.s32.totalorder %s661_s8, %s662_s17  ;;  %p667_p11 = scmp.lt.s32.totalorder %s661_s8, %s925_s3 }
  0x37   : > { %478 = vmatpush.msra.mxu2 %v228_v3  ;;  %254 = vmatpush.msra.mxu0 %v228_v3  ;;  %p668_p2 = scmp.lt.s32.totalorder %s666_s22, %s662_s17 }
  0x38   : > { %465 = vmatmul.msk.f32.vlgmr.msra.gmra.mxu2 %vm232_vm0, %v227_v4  ;;  %464 = vmatmul.msk.f32.vlgmr.msra.gmra.mxu0 %vm232_vm0, %v226_v5  ;;  %p664_p4 = pnand %p663_p1, %p818_p3 }
  0x39   : > { %482 = vmatpush.msra.mxu3 %v308_v15  ;;  %333 = vmatpush.msra.mxu1 %v308_v15  ;;  %p669_p9 = por %p668_p2, %p667_p11 }
  0x3a   : > { %p665_p8 = pneg %p664_p4 }
  0x3c   : > { %p670_p10 = pnand %p669_p9, %p665_p8 }
  0xb5   : > { %v871_v7 = vpop.f32.mrf.mxu0 }
  0xb6   : > { %v262_v14 = vsel %vm232_vm0, %v871_v7, 0.0 }
  0xb7   : > { %v263_v16 = vrot.slane %v262_v14, 4 }
  0xb9   : > { %v264_v18 = vadd.f32 %v263_v16, %v262_v14 }
  0xbb   : > { %v867_v6 = vpop.f32.mrf.mxu2  ;;  %v265_v21 = vrot.slane %v264_v18, 2 }
  0xbc   : > { %302 = vrot.lane.b32.xlu1 %v867_v6, %s722_s18  ;;  %280 = vrot.lane.b32.xlu0 %v867_v6, %s723_s23  ;;  %v269_v8 = vsel %vm232_vm0, %v867_v6, 0.0 }
  0xbd   : > { %v270_v10 = vrot.slane %v269_v8, 4  ;;  %v266_v23 = vadd.f32 %v265_v21, %v264_v18 }
  0xbf   : > { %v271_v13 = vadd.f32 %v270_v10, %v269_v8  ;;  %v267_v27 = vrot.slane %v266_v23, 1 }
  0xc1   : > { %v272_v17 = vrot.slane %v271_v13, 2  ;;  %v268_v30 = vadd.f32 %v267_v27, %v266_v23 }
  0xc3   : > { %v273_v19 = vadd.f32 %v272_v17, %v271_v13 }
  0xc4   : > { %300 = vrot.lane.b32.xlu1 %v871_v7, %s722_s18  ;;  %278 = vrot.lane.b32.xlu0 %v871_v7, %s723_s23 }
  0xc5   : > { %v274_v20 = vrot.slane %v273_v19, 1 }
  0xc7   : > { %v275_v22 = vadd.f32 %v274_v20, %v273_v19 }
 0x12e   : > { %v281_v24 = vpop.permute.xlu0 %280  ;;  %v303_v38 = vpop.permute.xlu1 %302 }
 0x12f   : > { %v285_v25 = vmul.f32 %v281_v24, %v275_v22 }
 0x131   : > { %v293_v26 = vsel %vm232_vm0, %v285_v25, 0.0 }
 0x132   : > { %v294_v28 = vrot.slane %v293_v26, 4 }
 0x134   : > { %v295_v29 = vadd.f32 %v294_v28, %v293_v26 }
 0x136   : > { %v296_v31 = vrot.slane %v295_v29, 2  ;;  %v279_v32 = vpop.permute.xlu0 %278  ;;  %v301_v46 = vpop.permute.xlu1 %300 }
 0x137   : > { %v284_v33 = vmul.f32 %v279_v32, %v268_v30 }
 0x138   : > { %v297_v34 = vadd.f32 %v296_v31, %v295_v29 }
 0x139   : > { %v286_v35 = vsel %vm232_vm0, %v284_v33, 0.0 }
 0x13a   : > { %v298_v36 = vrot.slane %v297_v34, 1  ;;  %v287_v37 = vrot.slane %v286_v35, 4 }
 0x13c   : > { %v288_v39 = vadd.f32 %v287_v37, %v286_v35  ;;  %v299_v40 = vadd.f32 %v298_v36, %v297_v34 }
 0x13e   : > { %v289_v41 = vrot.slane %v288_v39, 2  ;;  %v307_v42 = vmul.f32 %v303_v38, %v299_v40 }
 0x140   : > { %v290_v43 = vadd.f32 %v289_v41, %v288_v39  ;;  %467 = vmatmul.msk.f32.vlgmr.msra.gmra.mxu3 %vm232_vm0, %v307_v42 }
 0x142   : > { %v291_v44 = vrot.slane %v290_v43, 1 }
 0x144   : > { %v292_v45 = vadd.f32 %v291_v44, %v290_v43 }
 0x146   : > { %v306_v47 = vmul.f32 %v301_v46, %v292_v45 }
 0x148   : > { %466 = vmatmul.msk.f32.vlgmr.msra.gmra.mxu1 %vm232_vm0, %v306_v47 }
 0x1c3   : > { %v338_v48 = vpop.f32.mrf.mxu3 }
 0x1c4   : > { %v339_v49 = vadd.f32 %v338_v48, %v867_v6 }
 0x1c5   : > { %v335_v50 = vpop.f32.mrf.mxu1 }
 0x1c6   : > { %342 = vst.msk [vmem:[%s223_s28 + $0x8] sm:$0xff] %vm232_vm0, %v339_v49  ;;  %v336_v51 = vadd.f32 %v335_v50, %v871_v7 }
 0x1c8   : > { %341 = vst.msk [vmem:[%s223_s28] sm:$0xff] %vm232_vm0, %v336_v51 }
 0x1c9   : > { %673 = shalt.err (!%p670_p10)
}
 0x1ca   : > { %s724_s11 = smov 128   ;;  %s725_s5 = smov 8  }
 0x1cb   : > { %493 = dma.vmem_to_hbm [thread:$0]  (%p818_p3), %s357_s4, 256, %s359_s7, %s344_s16, %s724_s11, %s724_s11, %s725_s5  }
 0x1cc PF: > { %s373_s18 = sand.u32 1, %s704_s12   ;;  %p931_p12 = scmp.ge.s32.totalorder %s716_s15, 2 }
 0x1cd   : > { %s374_s23 = scalar_lea.sflag [#allocation4], %s373_s18 }
 0x1ce   : > { %p507_p13 = pnand %p931_p12, %p781_p6 }
 0x1d0   : > { %p508_p0 = pneg %p507_p13 }
 0x1d2   : > { %699 = dma.done.wait (%p508_p0), %s374_s23, 256  }
 0x1d3   : > { %701 = vsyncadd (%p508_p0), %s374_s23, 4294967040  ;;  %p17_p5 = scmp.ge.s32.totalorder %s808_s6, 4   ;;  %s932_s12 = smov %s708_s13 }
 0x1d4   : > { %s933_s13 = smov %s712_s14  ;;  %s934_s14 = smov %s824_s10 }
 0x1d5   : > { %s935_s15 = smov %s808_s6  ;;  %19 = sbr.rel (!%p17_p5) target bundleno = 6 (0x6), region = 85 }
 0x1da   :  { %380 = vsyncpa [#allocation3], 1 }
 0x1db   :  { %382 = vsyncpa [#allocation3 + $0x1], 1 }
 0x1dc   :  { %383 = vsyncpa [#allocation6], 1 }
 0x1dd   :  { %384 = vsyncpa [#allocation4], 1 }
 0x1de   :  { %386 = vsyncpa [#allocation4 + $0x1], 1 }

</bundles_post_ra>
